<compile_context>
chip_gen: v7x
topology: tpu7x:2x2x1
jax: 0.10.0
libtpu: 0.0.40
codegen_flags: <defaults>
</compile_context>

<pallas_src>
import jax
import jax.numpy as jnp
from jax import lax
from jax.experimental import pallas as pl
from jax.experimental.pallas import tpu as pltpu

# ---- KAN spline configuration (pykan KAN(width=[1,1]) defaults) ------------
GRID_NUM = 5                      # number of grid intervals
SPLINE_K = 3                      # spline order (cubic)
GRID_LO, GRID_HI = -1.0, 1.0
_H = (GRID_HI - GRID_LO) / GRID_NUM
KNOTS = tuple(GRID_LO + (i - SPLINE_K) * _H
              for i in range(GRID_NUM + 2 * SPLINE_K + 1))   # 12 uniform knots
N_BASIS = GRID_NUM + SPLINE_K                                # 8 basis functions
N_KNOTS = len(KNOTS)                                         # 12
LANES = 128


def _pick_tile_blocks(q, cap, batch):
    """Pick #128-lane blocks per tile; prefer a divisor of q (=> no pad/slice copies)."""
    cap = max(1, min(cap, q))
    if batch == 1 and q >= 2:
        cap = min(cap, max(1, q // 2))      # >=2 grid tiles so both v7x TensorCores get work
    best = 1
    for d in range(1, cap + 1):
        if q % d == 0:
            best = d
    if best < max(1, cap // 2):             # divisors of q too small -> accept minimal padding
        ntiles = pl.cdiv(q, cap)
        if batch == 1:
            ntiles = max(ntiles, min(2, q))
        best = pl.cdiv(q, ntiles)
    return best


def ckan_conv2d(x_nchw, conv_w, conv_b, scale_base, scale_sp, coef, kan_bias,
                *, tile_n=8192, mxu_min_cin=16, vmem_budget_bytes=24 * 1024 * 1024):
    """1x1 conv + per-channel KAN activation.  x_nchw: (B, Cin, H, W) -> (B, Cout, H, W)."""
    B, Cin, H, W = x_nchw.shape
    Cout = conv_w.shape[0]
    hw = H * W
    f32 = jnp.float32

    use_mxu = Cin >= mxu_min_cin            # offload the channel mix to the idle MXU when wide

    # ---- pixel tiling: pixels on the lane axis, channels on the sublane axis ----
    hw128 = pl.cdiv(hw, LANES) * LANES
    q = hw128 // LANES
    per_block_bytes = (Cin + Cout) * LANES * x_nchw.dtype.itemsize     # x + out per 128 lanes
    cap = max(1, min(tile_n // LANES, vmem_budget_bytes // (2 * per_block_bytes)))
    tb = _pick_tile_blocks(q, cap, B)       # 128-lane blocks per grid tile
    tn = tb * LANES
    n_tiles = pl.cdiv(hw128, tn)
    hwp = n_tiles * tn

    x3 = x_nchw.reshape(B, Cin, hw)
    if hwp != hw:
        x3 = jnp.pad(x3, ((0, 0), (0, 0), (0, hwp - hw)))   # padded pixels sliced off later

    # ---- host-precomputed, lane-replicated per-channel parameter table ----
    # Truncated-power coefficients of the combined per-channel spline (scale_sp folded in):
    #   S_c(h) = sum_p d[c,p] * (h - K[p])_+^3   (exact everywhere; symmetric weights make
    #   the reflected form sum_p d[c,p]*(K[p]-h)_+^3 use the SAME coefficients).
    cs = coef.astype(f32) * scale_sp.astype(f32)[:, None]                 # (Cout, 8)
    w5 = jnp.array([1.0, -4.0, 6.0, -4.0, 1.0], f32) / (6.0 * _H ** 3)
    d = jnp.zeros((Cout, N_KNOTS), f32)
    for i in range(SPLINE_K + 2):
        d = d.at[:, i:i + N_BASIS].add(cs * w5[i])                        # d[:,p]=sum_i w5[i]*cs[:,p-i]

    rows = [conv_b.reshape(1, Cout).astype(f32),          # row 0: conv bias
            scale_base.reshape(1, Cout).astype(f32),      # row 1: scale_base
            kan_bias.reshape(1, Cout).astype(f32),        # row 2: kan_bias
            d.T.astype(f32)]                              # rows 3..14: knot coefficients
    ROW_D0 = 3
    ROW_W0 = ROW_D0 + N_KNOTS
    if not use_mxu:
        rows.append(conv_w.astype(f32).T)                 # rows ROW_W0+k: weight column w[:, k]
    tab2d = jnp.concatenate(rows, axis=0)                  # (n_tab, Cout)
    n_tab = tab2d.shape[0]
    table = jnp.broadcast_to(tab2d[:, :, None], (n_tab, Cout, LANES))     # lane-replicated

    half = N_KNOTS // 2
    split = 0.5 * (KNOTS[half - 1] + KNOTS[half])          # = 0.0 for the symmetric grid
    n_sub = tb
    unroll = True if n_sub <= 8 else 8

    def kernel(*refs):
        if use_mxu:
            x_ref, w_ref, tab_ref, o_ref = refs
        else:
            x_ref, tab_ref, o_ref = refs

        # ---- hoisted (loaded once per grid step) lane-replicated parameter vregs ----
        cbias = tab_ref[0].astype(f32)
        sbase = tab_ref[1].astype(f32)
        kbias = tab_ref[2].astype(f32)
        dcols = [tab_ref[ROW_D0 + p].astype(f32) for p in range(N_KNOTS)]
        if use_mxu:
            w_mat = w_ref[...].astype(f32)
        else:
            wcols = [tab_ref[ROW_W0 + k].astype(f32) for k in range(Cin)]

        def compute_chunk(off):
            x = x_ref[:, pl.ds(off, LANES)].astype(f32)                   # (Cin, 128)

            # ---- 1x1 conv ----
            if use_mxu:
                h = jnp.dot(w_mat, x, preferred_element_type=f32) + cbias
            else:
                h = cbias
                for k in range(Cin):                                      # VPU broadcast-FMAs
                    xk = jnp.broadcast_to(x[k:k + 1, :], (Cout, LANES))
                    h = h + wcols[k] * xk

            # ---- SiLU base branch: exp + approx reciprocal on EUP, 1 Newton step on VALU ----
            e = jnp.minimum(jnp.exp(-h), 1e30)            # clamp keeps the Newton step NaN-free
            den = 1.0 + e
            r = pl.reciprocal(den, approx=True)
            r = r * (2.0 - den * r)
            base = h * r

            # ---- spline branch: two-sided truncated-power cubics (no cancellation blowup) ----
            t = jnp.maximum(h - KNOTS[0], 0.0)
            acc_l = dcols[0] * (t * t * t)                 # exact (and auto-zero) for h < split
            for p in range(1, half):
                t = jnp.maximum(h - KNOTS[p], 0.0)
                acc_l = acc_l + dcols[p] * (t * t * t)
            t = jnp.maximum(KNOTS[half] - h, 0.0)
            acc_r = dcols[half] * (t * t * t)              # exact (and auto-zero) for h >= split
            for p in range(half + 1, N_KNOTS):
                t = jnp.maximum(KNOTS[p] - h, 0.0)
                acc_r = acc_r + dcols[p] * (t * t * t)
            spline = jnp.where(h < split, acc_l, acc_r)

            out = sbase * base + spline + kbias
            o_ref[:, pl.ds(off, LANES)] = out.astype(o_ref.dtype)

        if n_sub == 1:
            compute_chunk(0)
        else:
            def body(s, carry):
                compute_chunk(pl.multiple_of(s * LANES, LANES))
                return carry
            lax.fori_loop(0, n_sub, body, 0, unroll=unroll)

    in_specs = [pl.BlockSpec((None, Cin, tn), lambda b, i: (b, 0, i))]     # x: (Cin, tn)
    args = [x3]
    if use_mxu:
        in_specs.append(pl.BlockSpec((Cout, Cin), lambda b, i: (0, 0)))    # conv weight
        args.append(conv_w.astype(f32))
    in_specs.append(pl.BlockSpec((n_tab, Cout, LANES), lambda b, i: (0, 0, 0)))   # fused params
    args.append(table)

    out = pl.pallas_call(
        kernel,
        out_shape=jax.ShapeDtypeStruct((B, Cout, hwp), x_nchw.dtype),
        grid=(B, hwp // tn),
        in_specs=in_specs,
        out_specs=pl.BlockSpec((None, Cout, tn), lambda b, i: (b, 0, i)),
        compiler_params=pltpu.CompilerParams(
            dimension_semantics=("parallel", "parallel")),
    )(*args)

    if hwp != hw:
        out = out[:, :, :hw]
    return out.reshape(B, Cout, H, W)   # already NCHW — no transposes


def _reference(x_nchw, conv_w, conv_b, scale_base, scale_sp, coef, kan_bias):
    """Pure-JAX reference with the original math (full Cox-de Boor), for sanity checking."""
    B, Cin, H, W = x_nchw.shape
    Cout = conv_w.shape[0]
    x_rows = jnp.transpose(x_nchw, (0, 2, 3, 1)).reshape(-1, Cin).astype(jnp.float32)
    h = jnp.einsum('nk,ck->nc', x_rows, conv_w.astype(jnp.float32),
                   precision=jax.lax.Precision.HIGHEST) + conv_b
    base = h * jax.nn.sigmoid(h)
    Bs = [jnp.where((h >= KNOTS[i]) & (h < KNOTS[i + 1]), 1.0, 0.0)
          for i in range(len(KNOTS) - 1)]
    for d in range(1, SPLINE_K + 1):
        Bs = [(h - KNOTS[i]) / (KNOTS[i + d] - KNOTS[i]) * Bs[i]
              + (KNOTS[i + d + 1] - h) / (KNOTS[i + d + 1] - KNOTS[i + 1]) * Bs[i + 1]
              for i in range(len(Bs) - 1)]
    spline = sum(Bs[j] * coef[:, j][None, :] for j in range(N_BASIS))
    y = scale_base[None, :] * base + scale_sp[None, :] * spline + kan_bias[None, :]
    return jnp.transpose(y.reshape(B, H, W, Cout), (0, 3, 1, 2)).astype(x_nchw.dtype)


if __name__ == "__main__":
    # small shapes: B=2, Cin=4, Cout=8, H=W=16
    B, Cin, Cout, H, W = 2, 4, 8, 16, 16

    key = jax.random.PRNGKey(0)
    kx, kw, kb, kc, ksb = jax.random.split(key, 5)

    x = jax.random.normal(kx, (B, Cin, H, W), dtype=jnp.float32)

    # deterministic "synthetic checkpoint" parameters
    bound = 1.0 / (Cin ** 0.5)                      # fan_in of a 1x1 kernel
    conv_w = jax.random.uniform(kw, (Cout, Cin), jnp.float32, -bound, bound)
    conv_b = jax.random.uniform(kb, (Cout,), jnp.float32, -bound, bound)

    coef = 0.1 * jax.random.normal(kc, (Cout, N_BASIS), dtype=jnp.float32)
    scale_base = 1.0 + 0.1 * jax.random.normal(ksb, (Cout,), dtype=jnp.float32)
    scale_sp = jnp.ones((Cout,), jnp.float32)
    kan_bias = jnp.zeros((Cout,), jnp.float32)

    y = ckan_conv2d(x, conv_w, conv_b, scale_base, scale_sp, coef, kan_bias)
    y = jax.block_until_ready(y)

    y_ref = _reference(x, conv_w, conv_b, scale_base, scale_sp, coef, kan_bias)
    assert y.shape == (B, Cout, H, W)
    err = float(jnp.max(jnp.abs(y - y_ref)))
    assert err < 2e-4, f"mismatch vs reference: {err}"

    # TODO(synk): newer pykan (MultKAN) adds extra per-node affine terms after the spline
    # layer; here they are folded into the single per-channel affine (scale_sp / kan_bias),
    # matching the classic KANLayer formulation used by the reference.
    print("KERNEL_OK")
</pallas_src>

<mosaic_0001>
module attributes {stable_mosaic.version = 11 : i64} {
  func.func @kernel(%arg0: i32, %arg1: i32, %arg2: memref<1x4x256xf32, #tpu.memory_space<vmem>>, %arg3: memref<19x8x128xf32, #tpu.memory_space<vmem>>, %arg4: memref<1x8x256xf32, #tpu.memory_space<vmem>>) attributes {dimension_semantics = [#tpu.dimension_semantics<parallel>, #tpu.dimension_semantics<parallel>], iteration_bounds = array<i64: 2, 1>, scalar_prefetch = 0 : i64, scratch_operands = 0 : i64, tpu.core_type = #tpu.core_type<tc>, window_params = [{transform_indices = @transform_0, window_bounds = array<i64: 1, 4, 256>}, {pipeline_mode = #tpu.pipeline_mode<synchronous>, transform_indices = @transform_1, window_bounds = array<i64: 19, 8, 128>}, {transform_indices = @transform_2, window_bounds = array<i64: 1, 8, 256>}]} {
    %c0 = arith.constant 0 : index
    %c0_0 = arith.constant 0 : index
    %c0_1 = arith.constant 0 : index
    %0 = vector.load %arg3[%c0, %c0_0, %c0_1] : memref<19x8x128xf32, #tpu.memory_space<vmem>>, vector<1x8x128xf32>
    %1 = vector.shape_cast %0 : vector<1x8x128xf32> to vector<8x128xf32>
    %c1 = arith.constant 1 : index
    %c0_2 = arith.constant 0 : index
    %c0_3 = arith.constant 0 : index
    %2 = vector.load %arg3[%c1, %c0_2, %c0_3] : memref<19x8x128xf32, #tpu.memory_space<vmem>>, vector<1x8x128xf32>
    %3 = vector.shape_cast %2 : vector<1x8x128xf32> to vector<8x128xf32>
    %c2 = arith.constant 2 : index
    %c0_4 = arith.constant 0 : index
    %c0_5 = arith.constant 0 : index
    %4 = vector.load %arg3[%c2, %c0_4, %c0_5] : memref<19x8x128xf32, #tpu.memory_space<vmem>>, vector<1x8x128xf32>
    %5 = vector.shape_cast %4 : vector<1x8x128xf32> to vector<8x128xf32>
    %c3 = arith.constant 3 : index
    %c0_6 = arith.constant 0 : index
    %c0_7 = arith.constant 0 : index
    %6 = vector.load %arg3[%c3, %c0_6, %c0_7] : memref<19x8x128xf32, #tpu.memory_space<vmem>>, vector<1x8x128xf32>
    %7 = vector.shape_cast %6 : vector<1x8x128xf32> to vector<8x128xf32>
    %c4 = arith.constant 4 : index
    %c0_8 = arith.constant 0 : index
    %c0_9 = arith.constant 0 : index
    %8 = vector.load %arg3[%c4, %c0_8, %c0_9] : memref<19x8x128xf32, #tpu.memory_space<vmem>>, vector<1x8x128xf32>
    %9 = vector.shape_cast %8 : vector<1x8x128xf32> to vector<8x128xf32>
    %c5 = arith.constant 5 : index
    %c0_10 = arith.constant 0 : index
    %c0_11 = arith.constant 0 : index
    %10 = vector.load %arg3[%c5, %c0_10, %c0_11] : memref<19x8x128xf32, #tpu.memory_space<vmem>>, vector<1x8x128xf32>
    %11 = vector.shape_cast %10 : vector<1x8x128xf32> to vector<8x128xf32>
    %c6 = arith.constant 6 : index
    %c0_12 = arith.constant 0 : index
    %c0_13 = arith.constant 0 : index
    %12 = vector.load %arg3[%c6, %c0_12, %c0_13] : memref<19x8x128xf32, #tpu.memory_space<vmem>>, vector<1x8x128xf32>
    %13 = vector.shape_cast %12 : vector<1x8x128xf32> to vector<8x128xf32>
    %c7 = arith.constant 7 : index
    %c0_14 = arith.constant 0 : index
    %c0_15 = arith.constant 0 : index
    %14 = vector.load %arg3[%c7, %c0_14, %c0_15] : memref<19x8x128xf32, #tpu.memory_space<vmem>>, vector<1x8x128xf32>
    %15 = vector.shape_cast %14 : vector<1x8x128xf32> to vector<8x128xf32>
    %c8 = arith.constant 8 : index
    %c0_16 = arith.constant 0 : index
    %c0_17 = arith.constant 0 : index
    %16 = vector.load %arg3[%c8, %c0_16, %c0_17] : memref<19x8x128xf32, #tpu.memory_space<vmem>>, vector<1x8x128xf32>
    %17 = vector.shape_cast %16 : vector<1x8x128xf32> to vector<8x128xf32>
    %c9 = arith.constant 9 : index
    %c0_18 = arith.constant 0 : index
    %c0_19 = arith.constant 0 : index
    %18 = vector.load %arg3[%c9, %c0_18, %c0_19] : memref<19x8x128xf32, #tpu.memory_space<vmem>>, vector<1x8x128xf32>
    %19 = vector.shape_cast %18 : vector<1x8x128xf32> to vector<8x128xf32>
    %c10 = arith.constant 10 : index
    %c0_20 = arith.constant 0 : index
    %c0_21 = arith.constant 0 : index
    %20 = vector.load %arg3[%c10, %c0_20, %c0_21] : memref<19x8x128xf32, #tpu.memory_space<vmem>>, vector<1x8x128xf32>
    %21 = vector.shape_cast %20 : vector<1x8x128xf32> to vector<8x128xf32>
    %c11 = arith.constant 11 : index
    %c0_22 = arith.constant 0 : index
    %c0_23 = arith.constant 0 : index
    %22 = vector.load %arg3[%c11, %c0_22, %c0_23] : memref<19x8x128xf32, #tpu.memory_space<vmem>>, vector<1x8x128xf32>
    %23 = vector.shape_cast %22 : vector<1x8x128xf32> to vector<8x128xf32>
    %c12 = arith.constant 12 : index
    %c0_24 = arith.constant 0 : index
    %c0_25 = arith.constant 0 : index
    %24 = vector.load %arg3[%c12, %c0_24, %c0_25] : memref<19x8x128xf32, #tpu.memory_space<vmem>>, vector<1x8x128xf32>
    %25 = vector.shape_cast %24 : vector<1x8x128xf32> to vector<8x128xf32>
    %c13 = arith.constant 13 : index
    %c0_26 = arith.constant 0 : index
    %c0_27 = arith.constant 0 : index
    %26 = vector.load %arg3[%c13, %c0_26, %c0_27] : memref<19x8x128xf32, #tpu.memory_space<vmem>>, vector<1x8x128xf32>
    %27 = vector.shape_cast %26 : vector<1x8x128xf32> to vector<8x128xf32>
    %c14 = arith.constant 14 : index
    %c0_28 = arith.constant 0 : index
    %c0_29 = arith.constant 0 : index
    %28 = vector.load %arg3[%c14, %c0_28, %c0_29] : memref<19x8x128xf32, #tpu.memory_space<vmem>>, vector<1x8x128xf32>
    %29 = vector.shape_cast %28 : vector<1x8x128xf32> to vector<8x128xf32>
    %c15 = arith.constant 15 : index
    %c0_30 = arith.constant 0 : index
    %c0_31 = arith.constant 0 : index
    %30 = vector.load %arg3[%c15, %c0_30, %c0_31] : memref<19x8x128xf32, #tpu.memory_space<vmem>>, vector<1x8x128xf32>
    %31 = vector.shape_cast %30 : vector<1x8x128xf32> to vector<8x128xf32>
    %c16 = arith.constant 16 : index
    %c0_32 = arith.constant 0 : index
    %c0_33 = arith.constant 0 : index
    %32 = vector.load %arg3[%c16, %c0_32, %c0_33] : memref<19x8x128xf32, #tpu.memory_space<vmem>>, vector<1x8x128xf32>
    %33 = vector.shape_cast %32 : vector<1x8x128xf32> to vector<8x128xf32>
    %c17 = arith.constant 17 : index
    %c0_34 = arith.constant 0 : index
    %c0_35 = arith.constant 0 : index
    %34 = vector.load %arg3[%c17, %c0_34, %c0_35] : memref<19x8x128xf32, #tpu.memory_space<vmem>>, vector<1x8x128xf32>
    %35 = vector.shape_cast %34 : vector<1x8x128xf32> to vector<8x128xf32>
    %c18 = arith.constant 18 : index
    %c0_36 = arith.constant 0 : index
    %c0_37 = arith.constant 0 : index
    %36 = vector.load %arg3[%c18, %c0_36, %c0_37] : memref<19x8x128xf32, #tpu.memory_space<vmem>>, vector<1x8x128xf32>
    %37 = vector.shape_cast %36 : vector<1x8x128xf32> to vector<8x128xf32>
    %c0_i32 = arith.constant 0 : i32
    %c128_i32 = arith.constant 128 : i32
    %38 = arith.muli %c0_i32, %c128_i32 : i32
    %39 = tpu.assume_multiple %38, 128 : i32
    %c0_38 = arith.constant 0 : index
    %c0_39 = arith.constant 0 : index
    %40 = arith.index_cast %39 : i32 to index
    %41 = vector.load %arg2[%c0_38, %c0_39, %40] : memref<1x4x256xf32, #tpu.memory_space<vmem>>, vector<1x4x128xf32>
    %42 = vector.shape_cast %41 : vector<1x4x128xf32> to vector<4x128xf32>
    %43 = vector.extract_strided_slice %42 {offsets = [0, 0], sizes = [1, 128], strides = [1, 1]} : vector<4x128xf32> to vector<1x128xf32>
    %44 = vector.shape_cast %43 : vector<1x128xf32> to vector<1x128xf32>
    %45 = vector.broadcast %44 : vector<1x128xf32> to vector<8x128xf32>
    %46 = arith.mulf %31, %45 : vector<8x128xf32>
    %47 = arith.addf %1, %46 : vector<8x128xf32>
    %48 = vector.extract_strided_slice %42 {offsets = [1, 0], sizes = [1, 128], strides = [1, 1]} : vector<4x128xf32> to vector<1x128xf32>
    %49 = vector.shape_cast %48 : vector<1x128xf32> to vector<1x128xf32>
    %50 = vector.broadcast %49 : vector<1x128xf32> to vector<8x128xf32>
    %51 = arith.mulf %33, %50 : vector<8x128xf32>
    %52 = arith.addf %47, %51 : vector<8x128xf32>
    %53 = vector.extract_strided_slice %42 {offsets = [2, 0], sizes = [1, 128], strides = [1, 1]} : vector<4x128xf32> to vector<1x128xf32>
    %54 = vector.shape_cast %53 : vector<1x128xf32> to vector<1x128xf32>
    %55 = vector.broadcast %54 : vector<1x128xf32> to vector<8x128xf32>
    %56 = arith.mulf %35, %55 : vector<8x128xf32>
    %57 = arith.addf %52, %56 : vector<8x128xf32>
    %58 = vector.extract_strided_slice %42 {offsets = [3, 0], sizes = [1, 128], strides = [1, 1]} : vector<4x128xf32> to vector<1x128xf32>
    %59 = vector.shape_cast %58 : vector<1x128xf32> to vector<1x128xf32>
    %60 = vector.broadcast %59 : vector<1x128xf32> to vector<8x128xf32>
    %61 = arith.mulf %37, %60 : vector<8x128xf32>
    %62 = arith.addf %57, %61 : vector<8x128xf32>
    %cst = arith.constant 0.000000e+00 : f32
    %63 = vector.broadcast %cst : f32 to vector<8x128xf32>
    %64 = arith.subf %63, %62 : vector<8x128xf32>
    %65 = math.exp %64 : vector<8x128xf32>
    %cst_40 = arith.constant 1.000000e+30 : f32
    %66 = vector.broadcast %cst_40 : f32 to vector<8x128xf32>
    %67 = arith.minimumf %65, %66 : vector<8x128xf32>
    %cst_41 = arith.constant 1.000000e+00 : f32
    %68 = vector.broadcast %cst_41 : f32 to vector<8x128xf32>
    %69 = arith.addf %68, %67 : vector<8x128xf32>
    %70 = tpu.reciprocal %69 {approx = true} : vector<8x128xf32> -> vector<8x128xf32>
    %71 = arith.mulf %69, %70 : vector<8x128xf32>
    %cst_42 = arith.constant 2.000000e+00 : f32
    %72 = vector.broadcast %cst_42 : f32 to vector<8x128xf32>
    %73 = arith.subf %72, %71 : vector<8x128xf32>
    %74 = arith.mulf %70, %73 : vector<8x128xf32>
    %75 = arith.mulf %62, %74 : vector<8x128xf32>
    %cst_43 = arith.constant -2.200000e+00 : f32
    %76 = vector.broadcast %cst_43 : f32 to vector<8x128xf32>
    %77 = arith.subf %62, %76 : vector<8x128xf32>
    %cst_44 = arith.constant 0.000000e+00 : f32
    %78 = vector.broadcast %cst_44 : f32 to vector<8x128xf32>
    %79 = arith.maximumf %77, %78 : vector<8x128xf32>
    %80 = arith.mulf %79, %79 : vector<8x128xf32>
    %81 = arith.mulf %80, %79 : vector<8x128xf32>
    %82 = arith.mulf %7, %81 : vector<8x128xf32>
    %cst_45 = arith.constant -1.800000e+00 : f32
    %83 = vector.broadcast %cst_45 : f32 to vector<8x128xf32>
    %84 = arith.subf %62, %83 : vector<8x128xf32>
    %cst_46 = arith.constant 0.000000e+00 : f32
    %85 = vector.broadcast %cst_46 : f32 to vector<8x128xf32>
    %86 = arith.maximumf %84, %85 : vector<8x128xf32>
    %87 = arith.mulf %86, %86 : vector<8x128xf32>
    %88 = arith.mulf %87, %86 : vector<8x128xf32>
    %89 = arith.mulf %9, %88 : vector<8x128xf32>
    %90 = arith.addf %82, %89 : vector<8x128xf32>
    %cst_47 = arith.constant -1.400000e+00 : f32
    %91 = vector.broadcast %cst_47 : f32 to vector<8x128xf32>
    %92 = arith.subf %62, %91 : vector<8x128xf32>
    %cst_48 = arith.constant 0.000000e+00 : f32
    %93 = vector.broadcast %cst_48 : f32 to vector<8x128xf32>
    %94 = arith.maximumf %92, %93 : vector<8x128xf32>
    %95 = arith.mulf %94, %94 : vector<8x128xf32>
    %96 = arith.mulf %95, %94 : vector<8x128xf32>
    %97 = arith.mulf %11, %96 : vector<8x128xf32>
    %98 = arith.addf %90, %97 : vector<8x128xf32>
    %cst_49 = arith.constant -1.000000e+00 : f32
    %99 = vector.broadcast %cst_49 : f32 to vector<8x128xf32>
    %100 = arith.subf %62, %99 : vector<8x128xf32>
    %cst_50 = arith.constant 0.000000e+00 : f32
    %101 = vector.broadcast %cst_50 : f32 to vector<8x128xf32>
    %102 = arith.maximumf %100, %101 : vector<8x128xf32>
    %103 = arith.mulf %102, %102 : vector<8x128xf32>
    %104 = arith.mulf %103, %102 : vector<8x128xf32>
    %105 = arith.mulf %13, %104 : vector<8x128xf32>
    %106 = arith.addf %98, %105 : vector<8x128xf32>
    %cst_51 = arith.constant -6.000000e-01 : f32
    %107 = vector.broadcast %cst_51 : f32 to vector<8x128xf32>
    %108 = arith.subf %62, %107 : vector<8x128xf32>
    %cst_52 = arith.constant 0.000000e+00 : f32
    %109 = vector.broadcast %cst_52 : f32 to vector<8x128xf32>
    %110 = arith.maximumf %108, %109 : vector<8x128xf32>
    %111 = arith.mulf %110, %110 : vector<8x128xf32>
    %112 = arith.mulf %111, %110 : vector<8x128xf32>
    %113 = arith.mulf %15, %112 : vector<8x128xf32>
    %114 = arith.addf %106, %113 : vector<8x128xf32>
    %cst_53 = arith.constant -2.000000e-01 : f32
    %115 = vector.broadcast %cst_53 : f32 to vector<8x128xf32>
    %116 = arith.subf %62, %115 : vector<8x128xf32>
    %cst_54 = arith.constant 0.000000e+00 : f32
    %117 = vector.broadcast %cst_54 : f32 to vector<8x128xf32>
    %118 = arith.maximumf %116, %117 : vector<8x128xf32>
    %119 = arith.mulf %118, %118 : vector<8x128xf32>
    %120 = arith.mulf %119, %118 : vector<8x128xf32>
    %121 = arith.mulf %17, %120 : vector<8x128xf32>
    %122 = arith.addf %114, %121 : vector<8x128xf32>
    %cst_55 = arith.constant 2.000000e-01 : f32
    %123 = vector.broadcast %cst_55 : f32 to vector<8x128xf32>
    %124 = arith.subf %123, %62 : vector<8x128xf32>
    %cst_56 = arith.constant 0.000000e+00 : f32
    %125 = vector.broadcast %cst_56 : f32 to vector<8x128xf32>
    %126 = arith.maximumf %124, %125 : vector<8x128xf32>
    %127 = arith.mulf %126, %126 : vector<8x128xf32>
    %128 = arith.mulf %127, %126 : vector<8x128xf32>
    %129 = arith.mulf %19, %128 : vector<8x128xf32>
    %cst_57 = arith.constant 6.000000e-01 : f32
    %130 = vector.broadcast %cst_57 : f32 to vector<8x128xf32>
    %131 = arith.subf %130, %62 : vector<8x128xf32>
    %cst_58 = arith.constant 0.000000e+00 : f32
    %132 = vector.broadcast %cst_58 : f32 to vector<8x128xf32>
    %133 = arith.maximumf %131, %132 : vector<8x128xf32>
    %134 = arith.mulf %133, %133 : vector<8x128xf32>
    %135 = arith.mulf %134, %133 : vector<8x128xf32>
    %136 = arith.mulf %21, %135 : vector<8x128xf32>
    %137 = arith.addf %129, %136 : vector<8x128xf32>
    %cst_59 = arith.constant 1.000000e+00 : f32
    %138 = vector.broadcast %cst_59 : f32 to vector<8x128xf32>
    %139 = arith.subf %138, %62 : vector<8x128xf32>
    %cst_60 = arith.constant 0.000000e+00 : f32
    %140 = vector.broadcast %cst_60 : f32 to vector<8x128xf32>
    %141 = arith.maximumf %139, %140 : vector<8x128xf32>
    %142 = arith.mulf %141, %141 : vector<8x128xf32>
    %143 = arith.mulf %142, %141 : vector<8x128xf32>
    %144 = arith.mulf %23, %143 : vector<8x128xf32>
    %145 = arith.addf %137, %144 : vector<8x128xf32>
    %cst_61 = arith.constant 1.400000e+00 : f32
    %146 = vector.broadcast %cst_61 : f32 to vector<8x128xf32>
    %147 = arith.subf %146, %62 : vector<8x128xf32>
    %cst_62 = arith.constant 0.000000e+00 : f32
    %148 = vector.broadcast %cst_62 : f32 to vector<8x128xf32>
    %149 = arith.maximumf %147, %148 : vector<8x128xf32>
    %150 = arith.mulf %149, %149 : vector<8x128xf32>
    %151 = arith.mulf %150, %149 : vector<8x128xf32>
    %152 = arith.mulf %25, %151 : vector<8x128xf32>
    %153 = arith.addf %145, %152 : vector<8x128xf32>
    %cst_63 = arith.constant 1.800000e+00 : f32
    %154 = vector.broadcast %cst_63 : f32 to vector<8x128xf32>
    %155 = arith.subf %154, %62 : vector<8x128xf32>
    %cst_64 = arith.constant 0.000000e+00 : f32
    %156 = vector.broadcast %cst_64 : f32 to vector<8x128xf32>
    %157 = arith.maximumf %155, %156 : vector<8x128xf32>
    %158 = arith.mulf %157, %157 : vector<8x128xf32>
    %159 = arith.mulf %158, %157 : vector<8x128xf32>
    %160 = arith.mulf %27, %159 : vector<8x128xf32>
    %161 = arith.addf %153, %160 : vector<8x128xf32>
    %cst_65 = arith.constant 2.200000e+00 : f32
    %162 = vector.broadcast %cst_65 : f32 to vector<8x128xf32>
    %163 = arith.subf %162, %62 : vector<8x128xf32>
    %cst_66 = arith.constant 0.000000e+00 : f32
    %164 = vector.broadcast %cst_66 : f32 to vector<8x128xf32>
    %165 = arith.maximumf %163, %164 : vector<8x128xf32>
    %166 = arith.mulf %165, %165 : vector<8x128xf32>
    %167 = arith.mulf %166, %165 : vector<8x128xf32>
    %168 = arith.mulf %29, %167 : vector<8x128xf32>
    %169 = arith.addf %161, %168 : vector<8x128xf32>
    %cst_67 = arith.constant 1.11022302E-16 : f32
    %170 = vector.broadcast %cst_67 : f32 to vector<8x128xf32>
    %171 = arith.cmpf olt, %62, %170 : vector<8x128xf32>
    %172 = arith.select %171, %122, %169 : vector<8x128xi1>, vector<8x128xf32>
    %173 = arith.mulf %3, %75 : vector<8x128xf32>
    %174 = arith.addf %173, %172 : vector<8x128xf32>
    %175 = arith.addf %174, %5 : vector<8x128xf32>
    %c0_68 = arith.constant 0 : index
    %c0_69 = arith.constant 0 : index
    %176 = arith.index_cast %39 : i32 to index
    %177 = vector.load %arg4[%c0_68, %c0_69, %176] : memref<1x8x256xf32, #tpu.memory_space<vmem>>, vector<1x8x128xf32>
    %178 = vector.shape_cast %177 : vector<1x8x128xf32> to vector<8x128xf32>
    %179 = vector.shape_cast %175 : vector<8x128xf32> to vector<1x8x128xf32>
    tpu.vector_store %arg4[%c0_68, %c0_69, %176], %179 {strides = array<i32>} : memref<1x8x256xf32, #tpu.memory_space<vmem>>, vector<1x8x128xf32>,
    %c1_i32 = arith.constant 1 : i32
    %c128_i32_70 = arith.constant 128 : i32
    %180 = arith.muli %c1_i32, %c128_i32_70 : i32
    %181 = tpu.assume_multiple %180, 128 : i32
    %c0_71 = arith.constant 0 : index
    %c0_72 = arith.constant 0 : index
    %182 = arith.index_cast %181 : i32 to index
    %183 = vector.load %arg2[%c0_71, %c0_72, %182] : memref<1x4x256xf32, #tpu.memory_space<vmem>>, vector<1x4x128xf32>
    %184 = vector.shape_cast %183 : vector<1x4x128xf32> to vector<4x128xf32>
    %185 = vector.extract_strided_slice %184 {offsets = [0, 0], sizes = [1, 128], strides = [1, 1]} : vector<4x128xf32> to vector<1x128xf32>
    %186 = vector.shape_cast %185 : vector<1x128xf32> to vector<1x128xf32>
    %187 = vector.broadcast %186 : vector<1x128xf32> to vector<8x128xf32>
    %188 = arith.mulf %31, %187 : vector<8x128xf32>
    %189 = arith.addf %1, %188 : vector<8x128xf32>
    %190 = vector.extract_strided_slice %184 {offsets = [1, 0], sizes = [1, 128], strides = [1, 1]} : vector<4x128xf32> to vector<1x128xf32>
    %191 = vector.shape_cast %190 : vector<1x128xf32> to vector<1x128xf32>
    %192 = vector.broadcast %191 : vector<1x128xf32> to vector<8x128xf32>
    %193 = arith.mulf %33, %192 : vector<8x128xf32>
    %194 = arith.addf %189, %193 : vector<8x128xf32>
    %195 = vector.extract_strided_slice %184 {offsets = [2, 0], sizes = [1, 128], strides = [1, 1]} : vector<4x128xf32> to vector<1x128xf32>
    %196 = vector.shape_cast %195 : vector<1x128xf32> to vector<1x128xf32>
    %197 = vector.broadcast %196 : vector<1x128xf32> to vector<8x128xf32>
    %198 = arith.mulf %35, %197 : vector<8x128xf32>
    %199 = arith.addf %194, %198 : vector<8x128xf32>
    %200 = vector.extract_strided_slice %184 {offsets = [3, 0], sizes = [1, 128], strides = [1, 1]} : vector<4x128xf32> to vector<1x128xf32>
    %201 = vector.shape_cast %200 : vector<1x128xf32> to vector<1x128xf32>
    %202 = vector.broadcast %201 : vector<1x128xf32> to vector<8x128xf32>
    %203 = arith.mulf %37, %202 : vector<8x128xf32>
    %204 = arith.addf %199, %203 : vector<8x128xf32>
    %cst_73 = arith.constant 0.000000e+00 : f32
    %205 = vector.broadcast %cst_73 : f32 to vector<8x128xf32>
    %206 = arith.subf %205, %204 : vector<8x128xf32>
    %207 = math.exp %206 : vector<8x128xf32>
    %cst_74 = arith.constant 1.000000e+30 : f32
    %208 = vector.broadcast %cst_74 : f32 to vector<8x128xf32>
    %209 = arith.minimumf %207, %208 : vector<8x128xf32>
    %cst_75 = arith.constant 1.000000e+00 : f32
    %210 = vector.broadcast %cst_75 : f32 to vector<8x128xf32>
    %211 = arith.addf %210, %209 : vector<8x128xf32>
    %212 = tpu.reciprocal %211 {approx = true} : vector<8x128xf32> -> vector<8x128xf32>
    %213 = arith.mulf %211, %212 : vector<8x128xf32>
    %cst_76 = arith.constant 2.000000e+00 : f32
    %214 = vector.broadcast %cst_76 : f32 to vector<8x128xf32>
    %215 = arith.subf %214, %213 : vector<8x128xf32>
    %216 = arith.mulf %212, %215 : vector<8x128xf32>
    %217 = arith.mulf %204, %216 : vector<8x128xf32>
    %cst_77 = arith.constant -2.200000e+00 : f32
    %218 = vector.broadcast %cst_77 : f32 to vector<8x128xf32>
    %219 = arith.subf %204, %218 : vector<8x128xf32>
    %cst_78 = arith.constant 0.000000e+00 : f32
    %220 = vector.broadcast %cst_78 : f32 to vector<8x128xf32>
    %221 = arith.maximumf %219, %220 : vector<8x128xf32>
    %222 = arith.mulf %221, %221 : vector<8x128xf32>
    %223 = arith.mulf %222, %221 : vector<8x128xf32>
    %224 = arith.mulf %7, %223 : vector<8x128xf32>
    %cst_79 = arith.constant -1.800000e+00 : f32
    %225 = vector.broadcast %cst_79 : f32 to vector<8x128xf32>
    %226 = arith.subf %204, %225 : vector<8x128xf32>
    %cst_80 = arith.constant 0.000000e+00 : f32
    %227 = vector.broadcast %cst_80 : f32 to vector<8x128xf32>
    %228 = arith.maximumf %226, %227 : vector<8x128xf32>
    %229 = arith.mulf %228, %228 : vector<8x128xf32>
    %230 = arith.mulf %229, %228 : vector<8x128xf32>
    %231 = arith.mulf %9, %230 : vector<8x128xf32>
    %232 = arith.addf %224, %231 : vector<8x128xf32>
    %cst_81 = arith.constant -1.400000e+00 : f32
    %233 = vector.broadcast %cst_81 : f32 to vector<8x128xf32>
    %234 = arith.subf %204, %233 : vector<8x128xf32>
    %cst_82 = arith.constant 0.000000e+00 : f32
    %235 = vector.broadcast %cst_82 : f32 to vector<8x128xf32>
    %236 = arith.maximumf %234, %235 : vector<8x128xf32>
    %237 = arith.mulf %236, %236 : vector<8x128xf32>
    %238 = arith.mulf %237, %236 : vector<8x128xf32>
    %239 = arith.mulf %11, %238 : vector<8x128xf32>
    %240 = arith.addf %232, %239 : vector<8x128xf32>
    %cst_83 = arith.constant -1.000000e+00 : f32
    %241 = vector.broadcast %cst_83 : f32 to vector<8x128xf32>
    %242 = arith.subf %204, %241 : vector<8x128xf32>
    %cst_84 = arith.constant 0.000000e+00 : f32
    %243 = vector.broadcast %cst_84 : f32 to vector<8x128xf32>
    %244 = arith.maximumf %242, %243 : vector<8x128xf32>
    %245 = arith.mulf %244, %244 : vector<8x128xf32>
    %246 = arith.mulf %245, %244 : vector<8x128xf32>
    %247 = arith.mulf %13, %246 : vector<8x128xf32>
    %248 = arith.addf %240, %247 : vector<8x128xf32>
    %cst_85 = arith.constant -6.000000e-01 : f32
    %249 = vector.broadcast %cst_85 : f32 to vector<8x128xf32>
    %250 = arith.subf %204, %249 : vector<8x128xf32>
    %cst_86 = arith.constant 0.000000e+00 : f32
    %251 = vector.broadcast %cst_86 : f32 to vector<8x128xf32>
    %252 = arith.maximumf %250, %251 : vector<8x128xf32>
    %253 = arith.mulf %252, %252 : vector<8x128xf32>
    %254 = arith.mulf %253, %252 : vector<8x128xf32>
    %255 = arith.mulf %15, %254 : vector<8x128xf32>
    %256 = arith.addf %248, %255 : vector<8x128xf32>
    %cst_87 = arith.constant -2.000000e-01 : f32
    %257 = vector.broadcast %cst_87 : f32 to vector<8x128xf32>
    %258 = arith.subf %204, %257 : vector<8x128xf32>
    %cst_88 = arith.constant 0.000000e+00 : f32
    %259 = vector.broadcast %cst_88 : f32 to vector<8x128xf32>
    %260 = arith.maximumf %258, %259 : vector<8x128xf32>
    %261 = arith.mulf %260, %260 : vector<8x128xf32>
    %262 = arith.mulf %261, %260 : vector<8x128xf32>
    %263 = arith.mulf %17, %262 : vector<8x128xf32>
    %264 = arith.addf %256, %263 : vector<8x128xf32>
    %cst_89 = arith.constant 2.000000e-01 : f32
    %265 = vector.broadcast %cst_89 : f32 to vector<8x128xf32>
    %266 = arith.subf %265, %204 : vector<8x128xf32>
    %cst_90 = arith.constant 0.000000e+00 : f32
    %267 = vector.broadcast %cst_90 : f32 to vector<8x128xf32>
    %268 = arith.maximumf %266, %267 : vector<8x128xf32>
    %269 = arith.mulf %268, %268 : vector<8x128xf32>
    %270 = arith.mulf %269, %268 : vector<8x128xf32>
    %271 = arith.mulf %19, %270 : vector<8x128xf32>
    %cst_91 = arith.constant 6.000000e-01 : f32
    %272 = vector.broadcast %cst_91 : f32 to vector<8x128xf32>
    %273 = arith.subf %272, %204 : vector<8x128xf32>
    %cst_92 = arith.constant 0.000000e+00 : f32
    %274 = vector.broadcast %cst_92 : f32 to vector<8x128xf32>
    %275 = arith.maximumf %273, %274 : vector<8x128xf32>
    %276 = arith.mulf %275, %275 : vector<8x128xf32>
    %277 = arith.mulf %276, %275 : vector<8x128xf32>
    %278 = arith.mulf %21, %277 : vector<8x128xf32>
    %279 = arith.addf %271, %278 : vector<8x128xf32>
    %cst_93 = arith.constant 1.000000e+00 : f32
    %280 = vector.broadcast %cst_93 : f32 to vector<8x128xf32>
    %281 = arith.subf %280, %204 : vector<8x128xf32>
    %cst_94 = arith.constant 0.000000e+00 : f32
    %282 = vector.broadcast %cst_94 : f32 to vector<8x128xf32>
    %283 = arith.maximumf %281, %282 : vector<8x128xf32>
    %284 = arith.mulf %283, %283 : vector<8x128xf32>
    %285 = arith.mulf %284, %283 : vector<8x128xf32>
    %286 = arith.mulf %23, %285 : vector<8x128xf32>
    %287 = arith.addf %279, %286 : vector<8x128xf32>
    %cst_95 = arith.constant 1.400000e+00 : f32
    %288 = vector.broadcast %cst_95 : f32 to vector<8x128xf32>
    %289 = arith.subf %288, %204 : vector<8x128xf32>
    %cst_96 = arith.constant 0.000000e+00 : f32
    %290 = vector.broadcast %cst_96 : f32 to vector<8x128xf32>
    %291 = arith.maximumf %289, %290 : vector<8x128xf32>
    %292 = arith.mulf %291, %291 : vector<8x128xf32>
    %293 = arith.mulf %292, %291 : vector<8x128xf32>
    %294 = arith.mulf %25, %293 : vector<8x128xf32>
    %295 = arith.addf %287, %294 : vector<8x128xf32>
    %cst_97 = arith.constant 1.800000e+00 : f32
    %296 = vector.broadcast %cst_97 : f32 to vector<8x128xf32>
    %297 = arith.subf %296, %204 : vector<8x128xf32>
    %cst_98 = arith.constant 0.000000e+00 : f32
    %298 = vector.broadcast %cst_98 : f32 to vector<8x128xf32>
    %299 = arith.maximumf %297, %298 : vector<8x128xf32>
    %300 = arith.mulf %299, %299 : vector<8x128xf32>
    %301 = arith.mulf %300, %299 : vector<8x128xf32>
    %302 = arith.mulf %27, %301 : vector<8x128xf32>
    %303 = arith.addf %295, %302 : vector<8x128xf32>
    %cst_99 = arith.constant 2.200000e+00 : f32
    %304 = vector.broadcast %cst_99 : f32 to vector<8x128xf32>
    %305 = arith.subf %304, %204 : vector<8x128xf32>
    %cst_100 = arith.constant 0.000000e+00 : f32
    %306 = vector.broadcast %cst_100 : f32 to vector<8x128xf32>
    %307 = arith.maximumf %305, %306 : vector<8x128xf32>
    %308 = arith.mulf %307, %307 : vector<8x128xf32>
    %309 = arith.mulf %308, %307 : vector<8x128xf32>
    %310 = arith.mulf %29, %309 : vector<8x128xf32>
    %311 = arith.addf %303, %310 : vector<8x128xf32>
    %cst_101 = arith.constant 1.11022302E-16 : f32
    %312 = vector.broadcast %cst_101 : f32 to vector<8x128xf32>
    %313 = arith.cmpf olt, %204, %312 : vector<8x128xf32>
    %314 = arith.select %313, %264, %311 : vector<8x128xi1>, vector<8x128xf32>
    %315 = arith.mulf %3, %217 : vector<8x128xf32>
    %316 = arith.addf %315, %314 : vector<8x128xf32>
    %317 = arith.addf %316, %5 : vector<8x128xf32>
    %c0_102 = arith.constant 0 : index
    %c0_103 = arith.constant 0 : index
    %318 = arith.index_cast %181 : i32 to index
    %319 = vector.load %arg4[%c0_102, %c0_103, %318] : memref<1x8x256xf32, #tpu.memory_space<vmem>>, vector<1x8x128xf32>
    %320 = vector.shape_cast %319 : vector<1x8x128xf32> to vector<8x128xf32>
    %321 = vector.shape_cast %317 : vector<8x128xf32> to vector<1x8x128xf32>
    tpu.vector_store %arg4[%c0_102, %c0_103, %318], %321 {strides = array<i32>} : memref<1x8x256xf32, #tpu.memory_space<vmem>>, vector<1x8x128xf32>,
    %c2_i32 = arith.constant 2 : i32
    return
  }
  func.func @transform_0(%arg0: i32, %arg1: i32) -> (i32, i32, i32) {
    %c0_i32 = arith.constant 0 : i32
    %c0_i32_0 = arith.constant 0 : i32
    return %arg0, %c0_i32, %arg1 : i32, i32, i32
  }
  func.func @transform_1(%arg0: i32, %arg1: i32) -> (i32, i32, i32) {
    %c0_i32 = arith.constant 0 : i32
    %c0_i32_0 = arith.constant 0 : i32
    %c0_i32_1 = arith.constant 0 : i32
    %c0_i32_2 = arith.constant 0 : i32
    return %c0_i32, %c0_i32_0, %c0_i32_1 : i32, i32, i32
  }
  func.func @transform_2(%arg0: i32, %arg1: i32) -> (i32, i32, i32) {
    %c0_i32 = arith.constant 0 : i32
    %c0_i32_0 = arith.constant 0 : i32
    return %arg0, %c0_i32, %arg1 : i32, i32, i32
  }
}

</mosaic_0001>

<bundles_post_ra>
// kernel: tpu_custom_call.1
= control target key start
LH: loop header
LB: loop body
LE: loop exit
PB: predicated region body
PF: predicated region fallthrough
CT: control target
= control target key end

     0   :  { %7 = vsyncpa [#allocation3], 0  ;;  %s1148_s0 = inlined_call_operand.hbm [shape: f32[2,4,256], index: 0, kind: input, shape index: {}]   ;;  %s1149_s1 = inlined_call_operand.hbm [shape: f32[19,8,128], index: 1, kind: input, shape index: {}]   ;;  %s1150_s2 = inlined_call_operand.hbm [shape: f32[2,8,256], index: 2, kind: output, shape index: {}]  }
   0x1   :  { %9 = vsyncpa [#allocation3 + $0x1], 0 }
   0x2   :  { %10 = vsyncpa [#allocation6], 0 }
   0x3   :  { %11 = vsyncpa [#allocation4], 0 }
   0x4   :  { %13 = vsyncpa [#allocation4 + $0x1], 0  ;;  %s849_s9 = smov 0   ;;  %s851_s10 = smov 0  }
   0x5   :  { %s853_s11 = smov 0   ;;  %s855_s12 = smov 0  }
   0x6   :  { %s857_s13 = smov 0   ;;  %s859_s14 = smov 0  }
   0x7 LB: > { %s567_s15 = sadd.s32 4294967295, %s827_s14   ;;  %s568_s16 = sadd.s32 4294967294, %s827_s14   ;;  %s827_s14 = sphi %s859_s14, %s19_s14   ;;  %s823_s13 = sphi %s857_s13, %s1174_s13   ;;  %s819_s12 = sphi %s855_s12, %s1173_s12   ;;  %s815_s11 = sphi %s853_s11, %s1172_s11   ;;  %s811_s10 = sphi %s851_s10, %s1171_s10   ;;  %s807_s9 = sphi %s849_s9, %s1170_s9  }
   0x8   : > { %p53_p0 = scmp.ne.s32.totalorder %s811_s10, %s807_s9  ;;  %p883_p1 = scmp.eq.s32.totalorder %s567_s15, 0 }
   0x9   : > { %p887_p2 = scmp.eq.s32.totalorder %s567_s15, 1  ;;  %p106_p3 = scmp.eq.s32.totalorder %s568_s16, 1 }
   0xa   : > { %s1155_s17 = scalar_select %p883_p1, 1, 0 }
   0xb   : > { %s1156_s18 = scalar_select %p887_p2, 1, 0 }
   0xc   : > { %p893_p4 = por %p883_p1, %p53_p0  ;;  %p569_p5 = scmp.ge.s32.totalorder %s827_s14, 1 }
   0xd   : > { %p898_p6 = por %p106_p3, %p53_p0  ;;  %p113_p7 = scmp.lt.s32.totalorder %s827_s14, 3 }
   0xe   : > { %s1157_s19 = scalar_select %p893_p4, 1, 0 }
   0xf   : > { %s1158_s20 = scalar_select %p898_p6, 1, 0 }
  0x10   : > { %p903_p8 = pnand %p569_p5, %p113_p7  ;;  %s829_s22 = smov [#allocation5]  }
  0x11   : > { %s125_s23 = sshll.u32 %s829_s22, 4  ;;  %s31_s25 = sadd.s32 1, %s823_s13  ;;  %s126_s23 = int_to_ptr.vmem [resolvable:$true] %s125_s23 }
  0x12   : > { %s1159_s21 = scalar_select %p903_p8, 1, 0 }
  0x13   : > { %p608_p9 = pneg %p903_p8  ;;  %s683_s28 = scalar_lea.hbm %s1149_s1, 2432 }
  0x14   : > { %p684_p12 = scmp.ne.s32.totalorder %s1149_s1, %s683_s28  ;;  %p690_p5 = scmp.lt.u32.totalorder %s683_s28, %s1149_s1 }
  0x15   : > { %p912_p11 = pnand %p608_p9, %p883_p1 }
  0x17   : > { %p685_p13 = pneg %p912_p11 }
  0x19   : > { %p686_p0 = pnand %p685_p13, %p684_p12 }
  0x1b   : > { %p687_p3 = pneg %p686_p0 }
  0x1d   : > { %p692_p7 = pnand %p690_p5, %p687_p3 }
  0x1f   : > { %695 = shalt.err (!%p692_p7)
}
  0x20   : > { %s696_s5 = scalar_lea.vmem %s126_s23, 2432  ;;  %p704_p1 = scmp.lt.s32.totalorder %s126_s23, %s126_s23 }
  0x21   : > { %p697_p9 = scmp.ne.s32.totalorder %s126_s23, %s696_s5  ;;  %p705_p4 = scmp.lt.s32.totalorder %s696_s5, %s696_s5 }
  0x23   : > { %p699_p10 = pnand %p697_p9, %p685_p13  ;;  %p706_p8 = por %p705_p4, %p704_p1 }
  0x25   : > { %p700_p6 = pneg %p699_p10 }
  0x27   : > { %p707_p2 = pnand %p706_p8, %p700_p6 }
  0x29   : > { %710 = shalt.err (!%p707_p2)
}
  0x2a   : > { %s830_s6 = smov 128   ;;  %s831_s7 = smov 8  }
  0x2b   : > { %611 = dma.hbm_to_vmem [thread:$0]  (!%p912_p11), %s1149_s1, 2432, %s126_s23, [#allocation6], %s830_s6, %s830_s6, %s831_s7  }
  0x2c   : > { %p33_p1 = scmp.ge.s32.totalorder %s31_s25, 2  ;;  %s40_s16 = sadd.s32 1, %s815_s11 }
  0x2d   : > { %p47_p2 = scmp.ne.s32.totalorder %s815_s11, %s811_s10  ;;  %p48_p4 = scmp.eq.s32.totalorder %s827_s14, 0 }
  0x2e   : > { %s1176_s25 = smov (%p33_p1, %s31_s25), 0  ;;  %p1162_p8 = scmp.ne.s32.totalorder %s1156_s18, 0 }
  0x2f   : > { %p939_p6 = por %p48_p4, %p47_p2  ;;  %s35_s24 = ssub.s32 %s823_s13, %s1176_s25 }
  0x30   : > { %p945_p10 = por %p1162_p8, %p47_p2  ;;  %p621_p12 = scmp.lt.s32.totalorder %s827_s14, 2 }
  0x31   : > { %p38_p11 = scmp.eq.s32.totalorder %s35_s24, 0  ;;  %s139_s23 = sand.u32 1, %s815_s11  }
  0x32   : > { %s572_s27 = sshll.u32 %s139_s23, 3  ;;  %s598_s29 = sshll.u32 %s823_s13, 7 }
  0x33   : > { %s954_s28 = scalar_select %p38_p11, %s815_s11, %s40_s16  }
  0x34   : > { %s960_s4 = scalar_lea.hbm %s1148_s0, %s598_s29  ;;  %s143_s18 = scalar_lea.vmem [#allocation2], %s572_s27 }
  0x35   : > { %s153_s5 = sshll.u32 %s143_s18, 4  ;;  %p966_p13 = pnand %p621_p12, %p939_p6  ;;  %s962_s5 = int_to_ptr.vmem [resolvable:$true] %s153_s5 }
  0x36   : > { %s140_s7 = scalar_lea.sflag [#allocation3], %s139_s23  ;;  %s711_s8 = scalar_lea.hbm %s960_s4, 128 }
  0x37   : > { %p712_p0 = scmp.ne.s32.totalorder %s960_s4, %s711_s8  ;;  %p713_p3 = pneg %p966_p13 }
  0x38   : > { %s716_s24 = scalar_lea.hbm %s1148_s0, 256  ;;  %p717_p9 = scmp.lt.u32.totalorder %s960_s4, %s1148_s0 }
  0x39   : > { %p714_p5 = pnand %p713_p3, %p712_p0  ;;  %p718_p1 = scmp.lt.u32.totalorder %s716_s24, %s711_s8 }
  0x3a   : > { %p720_p4 = scmp.lt.u32.totalorder %s711_s8, %s960_s4 }
  0x3b   : > { %p715_p7 = pneg %p714_p5  ;;  %p719_p2 = por %p718_p1, %p717_p9 }
  0x3d   : > { %p721_p6 = por %p720_p4, %p719_p2 }
  0x3f   : > { %p722_p8 = pnand %p721_p6, %p715_p7 }
  0x41   : > { %725 = shalt.err (!%p722_p8)
}
  0x42   : > { %s726_s23 = scalar_lea.vmem %s962_s5, 128  ;;  %s832_s29 = smov [#allocation2]  }
  0x43   : > { %p727_p12 = scmp.ne.s32.totalorder %s962_s5, %s726_s23  ;;  %s731_s30 = sshll.u32 %s832_s29, 4  ;;  %s732_s30 = int_to_ptr.vmem [resolvable:$false] %s731_s30 }
  0x44   : > { %s733_s3 = scalar_lea.vmem %s732_s30, 256  ;;  %p734_p5 = scmp.lt.s32.totalorder %s962_s5, %s732_s30 }
  0x45   : > { %p729_p11 = pnand %p727_p12, %p713_p3  ;;  %p735_p9 = scmp.lt.s32.totalorder %s733_s3, %s726_s23 }
  0x47   : > { %p730_p0 = pneg %p729_p11  ;;  %p736_p1 = por %p735_p9, %p734_p5 }
  0x49   : > { %p737_p2 = pnand %p736_p1, %p730_p0 }
  0x4b   : > { %740 = shalt.err (!%p737_p2)
}
  0x4c   : > { %615 = dma.hbm_to_vmem [thread:$0]  (!%p966_p13), %s960_s4, 128, %s962_s5, %s140_s7  }
  0x4d   : > { %p1165_p7 = scmp.ne.s32.totalorder %s1159_s21, 0 }
  0x4e   : > { %s998_s18 = sand.u32 (!%p1165_p7), 1, %s811_s10   ;;  %p1166_p3 = scmp.ne.s32.totalorder (!%p1165_p7), %s1157_s19, 0 }
  0x4f   : > { %162 = sbr.rel (%p1165_p7) target bundleno = 178 (0xb2), region = 28  ;;  %s576_s8 = sshll.u32 (!%p1165_p7), %s998_s18, 3 }
  0x50   : > { %s165_s15 = scalar_lea.sflag (!%p1165_p7), [#allocation3], %s998_s18  ;;  %s168_s16 = scalar_lea.vmem (!%p1165_p7), [#allocation2], %s576_s8 }
  0x56   : > { %794 = dma.done.wait (%p1166_p3), %s165_s15, 128  }
  0x57   : > { %796 = vsyncadd (%p1166_p3), %s165_s15, 4294967168  ;;  %p1167_p4 = scmp.ne.s32.totalorder %s1155_s17, 0 }
  0x59   : > { %798 = dma.done.wait (%p1167_p4), [#allocation6], 2432  }
  0x5a   : > { %800 = vsyncadd (%p1167_p4), [#allocation6], 4294964864  ;;  %v233_v0 = vlaneseq  ;;  %v225_v5 = vld [vmem:[#allocation5 + $0x78] sm:$0xff]  ;;  %v227_v7 = vld [vmem:[#allocation5 + $0x80] sm:$0xff]  ;;  %s578_s17 = sshll.u32 %s998_s18, 4  ;;  %s599_s4 = sshll.u32 %s819_s12, 8 }
  0x5b   : > { %v232_v8 = vld [vmem:[%s168_s16] sm:$0xf]  ;;  %v585_v9 = vld [vmem:[%s168_s16 + $0x4] sm:$0xf]  ;;  %v195_v13 = vld [vmem:[#allocation5] sm:$0xff]  ;;  %s192_s19 = scalar_lea.vmem [#allocation7], %s578_s17  ;;  %s1101_s7 = scalar_lea.hbm %s1150_s2, %s599_s4 }
  0x5c   : > { %v234_v1 = vshrl.u32 %v233_v0, 7  ;;  %v229_v14 = vld [vmem:[#allocation5 + $0x88] sm:$0xff]  ;;  %v231_v19 = vld [vmem:[#allocation5 + $0x90] sm:$0xff]  ;;  %v1020_v53 = vld [vmem:[#allocation5 + $0x18] sm:$0xff]  ;;  %s473_s21 = sshll.u32 %s192_s19, 4  ;;  %s457_s24 = scalar_lea.sflag [#allocation4], %s998_s18  ;;  %s1096_s21 = int_to_ptr.vmem [resolvable:$true] %s473_s21 }
  0x5d   : > { %v1022_v54 = vld [vmem:[#allocation5 + $0x20] sm:$0xff]  ;;  %v1024_v59 = vld [vmem:[#allocation5 + $0x28] sm:$0xff]  ;;  %s741_s22 = scalar_lea.vmem %s1096_s21, 256  ;;  %s833_s12 = smov [#allocation7]  }
  0x5e   : > { %v235_v2 = vsub.s32 0, %v234_v1  ;;  %v241_v3 = vsub.s32 1, %v234_v1  ;;  %v247_v4 = vsub.s32 2, %v234_v1  ;;  %v253_v6 = vsub.s32 3, %v234_v1  ;;  %p742_p13 = scmp.ne.s32.totalorder %s1096_s21, %s741_s22  ;;  %s745_s27 = sshll.u32 %s833_s12, 4  ;;  %s746_s27 = int_to_ptr.vmem [resolvable:$false] %s745_s27 }
  0x5f   : > { %s747_s23 = scalar_lea.vmem %s746_s27, 512  ;;  %p748_p12 = scmp.lt.s32.totalorder %s1096_s21, %s746_s27 }
  0x60   : > { %v236_v10 = vrot.slane %v232_v8, %v235_v2  ;;  %v242_v11 = vrot.slane %v232_v8, %v241_v3  ;;  %v248_v12 = vrot.slane %v232_v8, %v247_v4  ;;  %v348_v15 = vrot.slane %v585_v9, %v235_v2  ;;  %p743_p6 = pnand %p742_p13, %p945_p10  ;;  %p749_p11 = scmp.lt.s32.totalorder %s747_s23, %s741_s22 }
  0x61   : > { %v254_v18 = vrot.slane %v232_v8, %v253_v6  ;;  %v354_v23 = vrot.slane %v585_v9, %v241_v3  ;;  %v360_v26 = vrot.slane %v585_v9, %v247_v4  ;;  %v366_v27 = vrot.slane %v585_v9, %v253_v6  ;;  %v1027_v3 = vld [vmem:[#allocation5 + $0x30] sm:$0xff] }
  0x62   : > { %v237_v16 = vmul.f32 %v236_v10, %v225_v5  ;;  %v243_v17 = vmul.f32 %v242_v11, %v227_v7  ;;  %v249_v21 = vmul.f32 %v248_v12, %v229_v14  ;;  %v349_v22 = vmul.f32 %v348_v15, %v225_v5  ;;  %p744_p8 = pneg %p743_p6  ;;  %p750_p0 = por %p749_p11, %p748_p12 }
  0x63   : > { %v255_v25 = vmul.f32 %v254_v18, %v231_v19  ;;  %v355_v30 = vmul.f32 %v354_v23, %v227_v7  ;;  %v361_v32 = vmul.f32 %v360_v26, %v229_v14  ;;  %v367_v33 = vmul.f32 %v366_v27, %v231_v19  ;;  %v1031_v7 = vld [vmem:[#allocation5 + $0x48] sm:$0xff] }
  0x64   : > { %v238_v20 = vadd.f32 %v237_v16, %v195_v13  ;;  %v350_v29 = vadd.f32 %v349_v22, %v195_v13  ;;  %v1038_v16 = vld [vmem:[#allocation5 + $0x50] sm:$0xff]  ;;  %p751_p5 = pnand %p750_p0, %p744_p8 }
  0x66   : > { %v244_v24 = vadd.f32 %v243_v17, %v238_v20  ;;  %v356_v41 = vadd.f32 %v355_v30, %v350_v29  ;;  %v1045_v30 = vld [vmem:[#allocation5 + $0x38] sm:$0xff] }
  0x68   : > { %v250_v28 = vadd.f32 %v249_v21, %v244_v24  ;;  %v362_v58 = vadd.f32 %v361_v32, %v356_v41  ;;  %v1047_v32 = vld [vmem:[#allocation5 + $0x40] sm:$0xff] }
  0x6a   : > { %v1010_v31 = vadd.f32 %v255_v25, %v250_v28  ;;  %v1034_v11 = vadd.f32 %v367_v33, %v362_v58 }
  0x6c   : > { %v257_v34 = vsub.f32 0.0, %v1010_v31  ;;  %v579_v35 = vadd.f32 2.2, %v1010_v31  ;;  %v580_v36 = vadd.f32 1.8, %v1010_v31  ;;  %v582_v37 = vadd.f32 1.0, %v1010_v31 }
  0x6d   : > { %v581_v38 = vadd.f32 1.4, %v1010_v31  ;;  %v583_v39 = vadd.f32 0.6, %v1010_v31  ;;  %v584_v40 = vadd.f32 0.2, %v1010_v31 }
  0x6e   : > { %v258_v42 = vmul.f32 1.442695, %v257_v34  ;;  %v268_v43 = vmax.f32 %v579_v35, 0.0  ;;  %v273_v44 = vmax.f32 %v580_v36, 0.0  ;;  %v285_v45 = vmax.f32 %v582_v37, 0.0  ;;  %v1051_v37 = vld [vmem:[#allocation5 + $0x58] sm:$0xff] }
  0x6f   : > { %v279_v46 = vmax.f32 %v581_v38, 0.0  ;;  %v291_v47 = vmax.f32 %v583_v39, 0.0  ;;  %v297_v48 = vmax.f32 %v584_v40, 0.0  ;;  %v302_v49 = vsub.f32 0.2, %v1010_v31  ;;  %v1053_v38 = vld [vmem:[#allocation5 + $0x60] sm:$0xff] }
  0x70   : > { %675 = vpow2.f32 %v258_v42  ;;  %v269_v50 = vmul.f32 %v268_v43, %v268_v43  ;;  %v274_v51 = vmul.f32 %v273_v44, %v273_v44  ;;  %v286_v52 = vmul.f32 %v285_v45, %v285_v45 }
  0x71   : > { %v280_v55 = vmul.f32 %v279_v46, %v279_v46  ;;  %v292_v56 = vmul.f32 %v291_v47, %v291_v47  ;;  %v303_v57 = vmax.f32 %v302_v49, 0.0  ;;  %v307_v62 = vsub.f32 0.6, %v1010_v31  ;;  %v1056_v49 = vld [vmem:[#allocation5 + $0x68] sm:$0xff] }
  0x72   : > { %v270_v60 = vmul.f32 %v269_v50, %v268_v43  ;;  %v275_v61 = vmul.f32 %v274_v51, %v273_v44  ;;  %v287_v0 = vmul.f32 %v286_v52, %v285_v45  ;;  %v298_v1 = vmul.f32 %v297_v48, %v297_v48 }
  0x73   : > { %v281_v63 = vmul.f32 %v280_v55, %v279_v46  ;;  %v304_v2 = vmul.f32 %v303_v57, %v303_v57  ;;  %v308_v6 = vmax.f32 %v307_v62, 0.0  ;;  %v293_v9 = vmul.f32 %v292_v56, %v291_v47 }
  0x74   : > { %v271_v4 = vmul.f32 %v270_v60, %v1020_v53  ;;  %v276_v5 = vmul.f32 %v275_v61, %v1022_v54  ;;  %v313_v14 = vsub.f32 1.0, %v1010_v31  ;;  %v319_v15 = vsub.f32 1.4, %v1010_v31 }
  0x75   : > { %v282_v8 = vmul.f32 %v281_v63, %v1024_v59  ;;  %v305_v10 = vmul.f32 %v304_v2, %v303_v57  ;;  %v309_v13 = vmul.f32 %v308_v6, %v308_v6  ;;  %v288_v17 = vmul.f32 %v287_v0, %v1027_v3  ;;  %v1064_v0 = vld [vmem:[#allocation5 + $0x70] sm:$0xff] }
  0x76   : > { %v277_v12 = vadd.f32 %v276_v5, %v271_v4  ;;  %v299_v18 = vmul.f32 %v298_v1, %v297_v48  ;;  %v325_v19 = vsub.f32 1.8, %v1010_v31  ;;  %v331_v20 = vsub.f32 2.2, %v1010_v31 }
  0x77   : > { %v306_v21 = vmul.f32 %v305_v10, %v1031_v7  ;;  %v310_v22 = vmul.f32 %v309_v13, %v308_v6  ;;  %v314_v23 = vmax.f32 %v313_v14, 0.0  ;;  %v320_v24 = vmax.f32 %v319_v15, 0.0 }
  0x78   : > { %v283_v25 = vadd.f32 %v282_v8, %v277_v12  ;;  %v326_v26 = vmax.f32 %v325_v19, 0.0  ;;  %v332_v27 = vmax.f32 %v331_v20, 0.0  ;;  %v369_v28 = vsub.f32 0.0, %v1034_v11 }
  0x79   : > { %v311_v33 = vmul.f32 %v310_v22, %v1038_v16  ;;  %v315_v34 = vmul.f32 %v314_v23, %v314_v23  ;;  %v321_v35 = vmul.f32 %v320_v24, %v320_v24  ;;  %v586_v36 = vadd.f32 2.2, %v1034_v11 }
  0x7a   : > { %v676_v29 = vpop.eup %675  ;;  %v327_v40 = vmul.f32 %v326_v26, %v326_v26  ;;  %v333_v41 = vmul.f32 %v332_v27, %v332_v27  ;;  %v370_v42 = vmul.f32 1.442695, %v369_v28  ;;  %v294_v47 = vmul.f32 %v293_v9, %v1045_v30 }
  0x7b   : > { %v260_v39 = vmin.f32 %v676_v29, 1e+30  ;;  %v312_v43 = vadd.f32 %v311_v33, %v306_v21  ;;  %v316_v44 = vmul.f32 %v315_v34, %v314_v23  ;;  %v322_v45 = vmul.f32 %v321_v35, %v320_v24 }
  0x7c   : > { %v328_v48 = vmul.f32 %v327_v40, %v326_v26  ;;  %677 = vpow2.f32 %v370_v42  ;;  %v300_v50 = vmul.f32 %v299_v18, %v1047_v32  ;;  %v380_v55 = vmax.f32 %v586_v36, 0.0 }
  0x7d   : > { %v261_v46 = vadd.f32 1.0, %v260_v39  ;;  %v317_v51 = vmul.f32 %v316_v44, %v1051_v37  ;;  %v323_v52 = vmul.f32 %v322_v45, %v1053_v38  ;;  %v289_v56 = vadd.f32 %v288_v17, %v283_v25 }
  0x7e   : > { %v334_v57 = vmul.f32 %v333_v41, %v332_v27  ;;  %v587_v58 = vadd.f32 1.8, %v1034_v11  ;;  %v381_v61 = vmul.f32 %v380_v55, %v380_v55  ;;  %v588_v62 = vadd.f32 1.4, %v1034_v11 }
  0x7f   : > { %679 = vrcp.f32 %v261_v46  ;;  %v318_v60 = vadd.f32 %v317_v51, %v312_v43  ;;  %v589_v63 = vadd.f32 1.0, %v1034_v11  ;;  %v329_v1 = vmul.f32 %v328_v48, %v1056_v49 }
  0x80   : > { %v385_v2 = vmax.f32 %v587_v58, 0.0  ;;  %v590_v4 = vadd.f32 0.6, %v1034_v11  ;;  %v591_v5 = vadd.f32 0.2, %v1034_v11  ;;  %v382_v8 = vmul.f32 %v381_v61, %v380_v55 }
  0x81   : > { %v324_v6 = vadd.f32 %v323_v52, %v318_v60  ;;  %v391_v9 = vmax.f32 %v588_v62, 0.0  ;;  %v397_v10 = vmax.f32 %v589_v63, 0.0  ;;  %v295_v12 = vadd.f32 %v294_v47, %v289_v56 }
  0x82   : > { %v386_v13 = vmul.f32 %v385_v2, %v385_v2  ;;  %v403_v14 = vmax.f32 %v590_v4, 0.0  ;;  %v414_v15 = vsub.f32 0.2, %v1034_v11  ;;  %v335_v17 = vmul.f32 %v334_v57, %v1064_v0 }
  0x83   : > { %v392_v18 = vmul.f32 %v391_v9, %v391_v9  ;;  %v398_v19 = vmul.f32 %v397_v10, %v397_v10  ;;  %v409_v20 = vmax.f32 %v591_v5, 0.0  ;;  %v330_v21 = vadd.f32 %v329_v1, %v324_v6 }
  0x84   : > { %v383_v22 = vmul.f32 %v382_v8, %v1020_v53  ;;  %v387_v23 = vmul.f32 %v386_v13, %v385_v2  ;;  %v415_v24 = vmax.f32 %v414_v15, 0.0  ;;  %v419_v26 = vsub.f32 0.6, %v1034_v11  ;;  %v197_v2 = vld [vmem:[#allocation5 + $0x8] sm:$0xff] }
  0x85   : > { %v393_v25 = vmul.f32 %v392_v18, %v391_v9  ;;  %v425_v27 = vsub.f32 1.0, %v1034_v11  ;;  %v399_v33 = vmul.f32 %v398_v19, %v397_v10  ;;  %v404_v34 = vmul.f32 %v403_v14, %v403_v14 }
  0x86   : > { %v678_v28 = vpop.eup %677  ;;  %v388_v29 = vmul.f32 %v387_v23, %v1022_v54  ;;  %v416_v35 = vmul.f32 %v415_v24, %v415_v24  ;;  %v301_v36 = vadd.f32 %v300_v50, %v295_v12  ;;  %vm337_vm0 = vcmp.lt.f32.partialorder %v1010_v31, 1.110223e-16 }
  0x87   : > { %v372_v39 = vmin.f32 %v678_v28, 1e+30  ;;  %v410_v40 = vmul.f32 %v409_v20, %v409_v20  ;;  %v336_v53 = vadd.f32 %v335_v17, %v330_v21  ;;  %v394_v43 = vmul.f32 %v393_v25, %v1024_v59 }
  0x88   : > { %v389_v42 = vadd.f32 %v388_v29, %v383_v22  ;;  %v417_v44 = vmul.f32 %v416_v35, %v415_v24  ;;  %v420_v48 = vmax.f32 %v419_v26, 0.0  ;;  %v426_v51 = vmax.f32 %v425_v27, 0.0  ;;  %v199_v22 = vld [vmem:[#allocation5 + $0x10] sm:$0xff] }
  0x89   : > { %v680_v41 = vpop.eup %679  ;;  %v373_v47 = vadd.f32 1.0, %v372_v39  ;;  %v400_v54 = vmul.f32 %v399_v33, %v1027_v3  ;;  %v405_v52 = vmul.f32 %v404_v34, %v403_v14  ;;  %v431_v55 = vsub.f32 1.4, %v1034_v11 }
  0x8a   : > { %v263_v45 = vmul.f32 %v680_v41, %v261_v46  ;;  %v437_v50 = vsub.f32 1.8, %v1034_v11  ;;  %v421_v57 = vmul.f32 %v420_v48, %v420_v48  ;;  %v427_v58 = vmul.f32 %v426_v51, %v426_v51 }
  0x8b   : > { %681 = vrcp.f32 %v373_v47  ;;  %v395_v60 = vadd.f32 %v394_v43, %v389_v42  ;;  %v432_v61 = vmax.f32 %v431_v55, 0.0  ;;  %v443_v59 = vsub.f32 2.2, %v1034_v11 }
  0x8c   : > { %v264_v56 = vsub.f32 2.0, %v263_v45  ;;  %v438_v62 = vmax.f32 %v437_v50, 0.0  ;;  %v418_v63 = vmul.f32 %v417_v44, %v1031_v7  ;;  %v422_v1 = vmul.f32 %v421_v57, %v420_v48 }
  0x8d   : > { %v428_v3 = vmul.f32 %v427_v58, %v426_v51  ;;  %v433_v4 = vmul.f32 %v432_v61, %v432_v61  ;;  %v444_v6 = vmax.f32 %v443_v59, 0.0  ;;  %v411_v9 = vmul.f32 %v410_v40, %v409_v20 }
  0x8e   : > { %v265_v46 = vmul.f32 %v680_v41, %v264_v56  ;;  %v439_v5 = vmul.f32 %v438_v62, %v438_v62  ;;  %v423_v10 = vmul.f32 %v422_v1, %v1038_v16  ;;  %v338_v13 = vsel %vm337_vm0, %v301_v36, %v336_v53 }
  0x8f   : > { %v429_v12 = vmul.f32 %v428_v3, %v1051_v37  ;;  %v434_v14 = vmul.f32 %v433_v4, %v432_v61  ;;  %v445_v17 = vmul.f32 %v444_v6, %v444_v6  ;;  %v401_v18 = vadd.f32 %v400_v54, %v395_v60 }
  0x90   : > { %v266_v8 = vmul.f32 %v265_v46, %v1010_v31  ;;  %v440_v15 = vmul.f32 %v439_v5, %v438_v62  ;;  %v406_v19 = vmul.f32 %v405_v52, %v1045_v30  ;;  %v424_v21 = vadd.f32 %v423_v10, %v418_v63 }
  0x91   : > { %v435_v23 = vmul.f32 %v434_v14, %v1053_v38  ;;  %v446_v20 = vmul.f32 %v445_v17, %v444_v6  ;;  %v412_v31 = vmul.f32 %v411_v9, %v1047_v32  ;;  %vm449_vm1 = vcmp.lt.f32.partialorder %v1034_v11, 1.110223e-16 }
  0x92   : > { %v339_v7 = vmul.f32 %v266_v8, %v197_v2  ;;  %v430_v16 = vadd.f32 %v429_v12, %v424_v21  ;;  %v441_v37 = vmul.f32 %v440_v15, %v1056_v49  ;;  %v407_v27 = vadd.f32 %v406_v19, %v401_v18 }
  0x93   : > { %v447_v29 = vmul.f32 %v446_v20, %v1064_v0 }
  0x94   : > { %v340_v24 = vadd.f32 %v339_v7, %v338_v13  ;;  %v436_v28 = vadd.f32 %v435_v23, %v430_v16  ;;  %v413_v34 = vadd.f32 %v412_v31, %v407_v27 }
  0x95   : > { %v682_v25 = vpop.eup %681 }
  0x96   : > { %v341_v26 = vadd.f32 %v340_v24, %v199_v22  ;;  %v375_v33 = vmul.f32 %v682_v25, %v373_v47  ;;  %v442_v30 = vadd.f32 %v441_v37, %v436_v28 }
  0x98   : > { %342 = vst [vmem:[%s192_s19] sm:$0xff] %v341_v26  ;;  %v376_v38 = vsub.f32 2.0, %v375_v33  ;;  %v448_v35 = vadd.f32 %v447_v29, %v442_v30 }
  0x9a   : > { %v377_v36 = vmul.f32 %v682_v25, %v376_v38  ;;  %v450_v49 = vsel %vm449_vm1, %v413_v34, %v448_v35 }
  0x9c   : > { %v378_v32 = vmul.f32 %v377_v36, %v1034_v11 }
  0x9e   : > { %v451_v39 = vmul.f32 %v378_v32, %v197_v2 }
  0xa0   : > { %v452_v40 = vadd.f32 %v451_v39, %v450_v49 }
  0xa2   : > { %v453_v0 = vadd.f32 %v452_v40, %v199_v22 }
  0xa4   : > { %592 = vst [vmem:[%s192_s19 + $0x8] sm:$0xff] %v453_v0 }
  0xa5   : > { %754 = shalt.err (!%p751_p5)
}
  0xa6   : > { %s755_s29 = scalar_lea.hbm %s1101_s7, 256  ;;  %s759_s18 = scalar_lea.hbm %s1150_s2, 512 }
  0xa7   : > { %p756_p9 = scmp.ne.s32.totalorder %s1101_s7, %s755_s29  ;;  %p760_p7 = scmp.lt.u32.totalorder %s1101_s7, %s1150_s2 }
  0xa8   : > { %p761_p3 = scmp.lt.u32.totalorder %s759_s18, %s755_s29  ;;  %p763_p13 = scmp.lt.u32.totalorder %s755_s29, %s1101_s7 }
  0xa9   : > { %p757_p1 = pnand %p756_p9, %p945_p10 }
  0xaa   : > { %p762_p4 = por %p761_p3, %p760_p7 }
  0xab   : > { %p758_p2 = pneg %p757_p1 }
  0xac   : > { %p764_p6 = por %p763_p13, %p762_p4 }
  0xae   : > { %p765_p8 = pnand %p764_p6, %p758_p2 }
  0xb0   : > { %768 = shalt.err (!%p765_p8)
}
  0xb1   : > { %606 = dma.vmem_to_hbm [thread:$0]  (%p945_p10), %s1096_s21, 256, %s1101_s7, %s457_s24  }
  0xb2 PF: > { %s485_s16 = sand.u32 1, %s807_s9   ;;  %p1168_p12 = scmp.ne.s32.totalorder %s1158_s20, 0 }
  0xb3   : > { %p1169_p11 = scmp.ge.s32.totalorder %s827_s14, 2  ;;  %s486_s17 = scalar_lea.sflag [#allocation4], %s485_s16 }
  0xb5   : > { %p617_p0 = pnand %p1169_p11, %p1168_p12 }
  0xb7   : > { %802 = dma.done.wait (!%p617_p0), %s486_s17, 256  }
  0xb8   : > { %804 = vsyncadd (!%p617_p0), %s486_s17, 4294967040  ;;  %s19_s14 = sadd.s32 1, %s827_s14   ;;  %s1170_s9 = smov %s811_s10 }
  0xb9   : > { %p16_p5 = scmp.ge.s32.totalorder %s19_s14, 4   ;;  %s1171_s10 = smov %s815_s11 }
  0xba   : > { %s1172_s11 = smov %s954_s28  ;;  %s1173_s12 = smov %s823_s13 }
  0xbb   : > { %s1174_s13 = smov %s1176_s25  ;;  %18 = sbr.rel (!%p16_p5) target bundleno = 7 (0x7), region = 97 }
  0xc2   :  { %491 = vsyncpa [#allocation3], 1 }
  0xc3   :  { %493 = vsyncpa [#allocation3 + $0x1], 1 }
  0xc4   :  { %494 = vsyncpa [#allocation6], 1 }
  0xc5   :  { %495 = vsyncpa [#allocation4], 1 }
  0xc6   :  { %497 = vsyncpa [#allocation4 + $0x1], 1 }

</bundles_post_ra>
